<compile_context>
chip_gen: v7x
topology: tpu7x:2x2x1
jax: 0.10.0
libtpu: 0.0.40
codegen_flags: <defaults>
</compile_context>

<pallas_src>
import math
from functools import partial

import jax
import jax.numpy as jnp
from jax.experimental import pallas as pl
from jax.experimental.pallas import tpu as pltpu


def _graphconv_fused_kernel(x_ref, g_ref, b_ref, o_ref):
    # x_ref : (TM, c_in*N)      row block of x (rows = flattened (b, t))
    # g_ref : (c_in*N, N*c_out) fused gso-kron-W operator (resident)
    # b_ref : (1, N*c_out)      bias tiled N times, f32 (resident)
    # o_ref : (TM, N*c_out)     lane-dense output slab
    acc = jnp.dot(x_ref[...], g_ref[...], preferred_element_type=jnp.float32)
    o_ref[...] = (acc + b_ref[...]).astype(o_ref.dtype)


def _choose_block_rows(m, cap=512):
    """Pick (tm, m_pad): tm divides m_pad, tm % 8 == 0 or tm == m_pad."""
    if m <= cap:
        return m, m                       # single block == full dim (always legal)
    cap8 = max(8, cap - cap % 8)
    for tm in range(cap8, 7, -8):         # multiples of 8 only
        if m % tm == 0:
            return tm, m
    tm = cap8                             # no aligned divisor: pad the row axis
    m_pad = -(-m // tm) * tm
    return tm, m_pad


@partial(jax.jit, static_argnames=("compute_dtype", "block_rows"))
def graph_conv(x, gso, weight, bias, *, compute_dtype=jnp.float32, block_rows=512):
    """x: (B, c_in, T, N). Returns (B, T, N, c_out) float32."""
    B, c_in, T, N = x.shape
    c_out = weight.shape[1]
    K = c_in * N
    NC = N * c_out
    M = B * T

    # --- tiny wrapper-side transforms (XLA-fused, no large HBM round trips) ---
    # Fused operator: G[c*N + i, h*c_out + j] = gso[h, i] * W[c, j]
    g = jnp.einsum("hi,cj->cihj", gso, weight).reshape(K, NC)
    # bias_row[0, h*c_out + j] = bias[j]   (kept f32: epilogue stays f32 on v5e)
    bias_row = jnp.tile(bias, (N,)).reshape(1, NC).astype(jnp.float32)
    # x rows: x_rows[b*T + t, c*N + i] = x[b, c, t, i]
    x_rows = jnp.transpose(x, (0, 2, 1, 3)).reshape(M, K)

    # Optional reduced-precision operands (accumulation stays f32 in-kernel).
    x_rows = x_rows.astype(compute_dtype)
    g = g.astype(compute_dtype)

    tm, m_pad = _choose_block_rows(M, block_rows)
    if m_pad != M:
        x_rows = jnp.pad(x_rows, ((0, m_pad - M), (0, 0)))

    grid = (m_pad // tm,)
    flops = 2 * m_pad * K * NC
    bytes_accessed = (
        x_rows.size * x_rows.dtype.itemsize
        + g.size * g.dtype.itemsize
        + bias_row.size * 4
        + m_pad * NC * 4
    )

    out = pl.pallas_call(
        _graphconv_fused_kernel,
        out_shape=jax.ShapeDtypeStruct((m_pad, NC), jnp.float32),
        grid_spec=pltpu.PrefetchScalarGridSpec(
            num_scalar_prefetch=0,
            grid=grid,
            in_specs=[
                pl.BlockSpec((tm, K), lambda m: (m, 0)),     # streamed x rows
                pl.BlockSpec((K, NC), lambda m: (0, 0)),     # resident fused operator
                pl.BlockSpec((1, NC), lambda m: (0, 0)),     # resident bias row
            ],
            out_specs=pl.BlockSpec((tm, NC), lambda m: (m, 0)),
        ),
        compiler_params=pltpu.CompilerParams(
            dimension_semantics=("parallel",),
            vmem_limit_bytes=32 * 1024 * 1024,
        ),
        cost_estimate=pl.CostEstimate(
            flops=flops, transcendentals=0, bytes_accessed=bytes_accessed
        ),
    )(x_rows, g, bias_row)

    # Free reshapes only: (m_pad, N*c_out) -> (B, T, N, c_out).
    return out[:M].reshape(B, T, N, c_out)


def _init_params(key, c_in, c_out, n_nodes):
    """Deterministic parameter init mirroring the PyTorch module's reset_parameters."""
    k_w, k_b, k_g = jax.random.split(key, 3)
    # kaiming_uniform_(weight, a=sqrt(5)) on a (c_in, c_out) tensor; PyTorch's
    # _calculate_fan_in_and_fan_out uses size(1) as fan_in -> fan_in = c_out.
    fan_in = c_out
    gain = math.sqrt(2.0 / (1.0 + 5.0))          # a = sqrt(5)
    w_bound = gain * math.sqrt(3.0 / fan_in)
    weight = jax.random.uniform(k_w, (c_in, c_out), jnp.float32, -w_bound, w_bound)
    b_bound = 1.0 / math.sqrt(fan_in) if fan_in > 0 else 0.0
    bias = jax.random.uniform(k_b, (c_out,), jnp.float32, -b_bound, b_bound)
    # gso: fixed row-normalized graph shift operator, built deterministically.
    adj = jax.random.uniform(k_g, (n_nodes, n_nodes), jnp.float32)
    adj = 0.5 * (adj + adj.T) + jnp.eye(n_nodes, dtype=jnp.float32)
    gso = adj / jnp.sum(adj, axis=1, keepdims=True)
    return weight, bias, gso


def _reference(x, gso, weight, bias):
    x_perm = jnp.transpose(x, (0, 2, 3, 1))
    first = jnp.einsum("hi,btij->bthj", gso, x_perm)
    second = jnp.einsum("bthi,ij->bthj", first, weight)
    return second + bias


if __name__ == "__main__":
    key = jax.random.PRNGKey(0)

    # --- primary check: module-sized shapes, f32, tight tolerance ------------
    B, c_in, T, N, c_out = 2, 4, 8, 16, 32
    k_x, k_p, k_x2 = jax.random.split(key, 3)
    x = jax.random.normal(k_x, (B, c_in, T, N), jnp.float32)
    weight, bias, gso = _init_params(k_p, c_in, c_out, N)

    out = jax.block_until_ready(graph_conv(x, gso, weight, bias))
    ref = _reference(x, gso, weight, bias)
    assert out.shape == (B, T, N, c_out), out.shape
    assert jnp.allclose(out, ref, atol=1e-5, rtol=1e-5), "f32 mismatch vs reference"

    # --- bf16 compute path (f32 accumulation/output), relaxed tolerance ------
    out_bf16 = jax.block_until_ready(
        graph_conv(x, gso, weight, bias, compute_dtype=jnp.bfloat16)
    )
    assert jnp.allclose(out_bf16, ref, atol=2e-2, rtol=2e-2), "bf16 mismatch vs reference"

    # --- multi-block grid + row-padding path ---------------------------------
    B2, T2 = 2, 101                       # B*T = 202: no 8-aligned divisor <= 64
    x2 = jax.random.normal(k_x2, (B2, c_in, T2, N), jnp.float32)
    out2 = jax.block_until_ready(graph_conv(x2, gso, weight, bias, block_rows=64))
    ref2 = _reference(x2, gso, weight, bias)
    assert out2.shape == (B2, T2, N, c_out), out2.shape
    assert jnp.allclose(out2, ref2, atol=1e-5, rtol=1e-5), "tiled-path mismatch vs reference"

    print("KERNEL_OK")
</pallas_src>

<mosaic_0001>
module attributes {stable_mosaic.version = 11 : i64} {
  func.func @_graphconv_fused_kernel(%arg0: i32, %arg1: memref<16x64xf32, #tpu.memory_space<vmem>>, %arg2: memref<64x512xf32, #tpu.memory_space<vmem>>, %arg3: memref<1x512xf32, #tpu.memory_space<vmem>>, %arg4: memref<16x512xf32, #tpu.memory_space<vmem>>) attributes {dimension_semantics = [#tpu.dimension_semantics<parallel>], iteration_bounds = array<i64: 1>, scalar_prefetch = 0 : i64, scratch_operands = 0 : i64, tpu.core_type = #tpu.core_type<tc>, window_params = [{transform_indices = @transform_0, window_bounds = array<i64: 16, 64>}, {pipeline_mode = #tpu.pipeline_mode<synchronous>, transform_indices = @transform_1, window_bounds = array<i64: 64, 512>}, {pipeline_mode = #tpu.pipeline_mode<synchronous>, transform_indices = @transform_2, window_bounds = array<i64: 1, 512>}, {transform_indices = @transform_3, window_bounds = array<i64: 16, 512>}]} {
    %c0 = arith.constant 0 : index
    %c0_0 = arith.constant 0 : index
    %0 = vector.load %arg1[%c0, %c0_0] : memref<16x64xf32, #tpu.memory_space<vmem>>, vector<16x64xf32>
    %c0_1 = arith.constant 0 : index
    %c0_2 = arith.constant 0 : index
    %1 = vector.load %arg2[%c0_1, %c0_2] : memref<64x512xf32, #tpu.memory_space<vmem>>, vector<64x512xf32>
    %cst = arith.constant dense<0.000000e+00> : vector<16x512xf32>
    %2 = tpu.matmul %0, %1, %cst {dimension_numbers = #tpu.dot_dimension_numbers<[1], [0], [0], [1], [0, 0, 1, 1], [], []>} : vector<16x64xf32>, vector<64x512xf32>, vector<16x512xf32> -> vector<16x512xf32>
    %c0_3 = arith.constant 0 : index
    %c0_4 = arith.constant 0 : index
    %3 = vector.load %arg3[%c0_3, %c0_4] : memref<1x512xf32, #tpu.memory_space<vmem>>, vector<1x512xf32>
    %4 = vector.broadcast %3 : vector<1x512xf32> to vector<16x512xf32>
    %5 = arith.addf %2, %4 : vector<16x512xf32>
    %c0_5 = arith.constant 0 : index
    %c0_6 = arith.constant 0 : index
    %6 = vector.load %arg4[%c0_5, %c0_6] : memref<16x512xf32, #tpu.memory_space<vmem>>, vector<16x512xf32>
    tpu.vector_store %arg4[%c0_5, %c0_6], %5 {strides = array<i32>} : memref<16x512xf32, #tpu.memory_space<vmem>>, vector<16x512xf32>,
    return
  }
  func.func @transform_0(%arg0: i32) -> (i32, i32) {
    %c0_i32 = arith.constant 0 : i32
    %c0_i32_0 = arith.constant 0 : i32
    return %arg0, %c0_i32 : i32, i32
  }
  func.func @transform_1(%arg0: i32) -> (i32, i32) {
    %c0_i32 = arith.constant 0 : i32
    %c0_i32_0 = arith.constant 0 : i32
    %c0_i32_1 = arith.constant 0 : i32
    return %c0_i32, %c0_i32_0 : i32, i32
  }
  func.func @transform_2(%arg0: i32) -> (i32, i32) {
    %c0_i32 = arith.constant 0 : i32
    %c0_i32_0 = arith.constant 0 : i32
    %c0_i32_1 = arith.constant 0 : i32
    return %c0_i32, %c0_i32_0 : i32, i32
  }
  func.func @transform_3(%arg0: i32) -> (i32, i32) {
    %c0_i32 = arith.constant 0 : i32
    %c0_i32_0 = arith.constant 0 : i32
    return %arg0, %c0_i32 : i32, i32
  }
}

</mosaic_0001>

<bundles_post_ra>
// kernel: tile.8
= control target key start
LH: loop header
LB: loop body
LE: loop exit
PB: predicated region body
PF: predicated region fallthrough
CT: control target
= control target key end

     0   :  { %s28_s0 = inlined_call_operand.vmem [shape: f32[32], index: 0, kind: input, shape index: {}]   ;;  %s29_s1 = inlined_call_operand.vmem [shape: f32[16,32], index: 1, kind: output, shape index: {}]  }
   0x1   :  { %v4_v0 = vld [vmem:[%s28_s0] ss:$0 sm:$0xff] }
   0x2   :  { %5 = vst [vmem:[%s29_s1] sm:$0xff] %v4_v0  ;;  %8 = vst [vmem:[%s29_s1 + $0x8] sm:$0xff] %v4_v0 }

// kernel: tile.9
= control target key start
LH: loop header
LB: loop body
LE: loop exit
PB: predicated region body
PF: predicated region fallthrough
CT: control target
= control target key end

     0   :  { %s57_s8 = smov 96   ;;  %vm3_vm0 = vcmask 261120   ;;  %s59_s15 = smov 64   ;;  %vm9_vm1 = vcmask 1048320   ;;  %vm15_vm2 = vcmask 785920   ;;  %vm21_vm3 = vcmask 523520   ;;  %s94_s0 = inlined_call_operand.vmem [shape: f32[16,32], index: 0, kind: input, shape index: {}]   ;;  %s95_s1 = inlined_call_operand.vmem [shape: f32[1,512], index: 1, kind: output, shape index: {}]  }
   0x1   :  { %v48_v0 = vld [vmem:[%s94_s0 + $0x3] ss:$4 sm:$0xf]   ;;  %v49_v1 = vld [vmem:[%s94_s0 + $0x2] ss:$4 sm:$0xf]  }
   0x2   :  { %7 = vrot.lane.b32.xlu0 %v48_v0, %s57_s8  ;;  %v50_v2 = vld [vmem:[%s94_s0 + $0x1] ss:$4 sm:$0xf]   ;;  %v2_v3 = vld [vmem:[%s94_s0] ss:$4 sm:$0xf]  }
   0x3   :  { %s58_s0 = smov 32   ;;  %4 = vst.msk [vmem:[#allocation0] ss:$8 sm:$0xf] %vm3_vm0, %v2_v3  }
   0x4   :  { %19 = vrot.lane.b32.xlu1 %v50_v2, %s58_s0 }
   0x6   :  { %13 = vrot.lane.b32.xlu0 %v49_v1, %s59_s15 }
  0x74   :  { %v8_v4 = vpop.permute.xlu0 %7  }
  0x75   :  { %10 = vst.msk [vmem:[#allocation0] ss:$8 sm:$0xf] %vm9_vm1, %v8_v4  }
  0x76   :  { %v20_v5 = vpop.permute.xlu1 %19  }
  0x78   :  { %v14_v6 = vpop.permute.xlu0 %13  }
  0x79   :  { %16 = vst.msk [vmem:[#allocation0] ss:$8 sm:$0xf] %vm15_vm2, %v14_v6  }
  0x7a   :  { %22 = vst.msk [vmem:[#allocation0] ss:$8 sm:$0xf] %vm21_vm3, %v20_v5  }
  0x81   :  { %v26_v7 = vld [vmem:[#allocation0] sm:$0x1]  ;;  %v30_v8 = vld [vmem:[#allocation0 + $0x8] sm:$0x1]  ;;  %v35_v9 = vld [vmem:[#allocation0 + $0x10] sm:$0x1] }
  0x82   :  { %28 = vst [vmem:[%s95_s1] sm:$0x1] %v26_v7  ;;  %51 = vst [vmem:[%s95_s1 + $0x1] sm:$0x1] %v30_v8  ;;  %v41_v10 = vld [vmem:[#allocation0 + $0x18] sm:$0x1] }
  0x83   :  { %52 = vst [vmem:[%s95_s1 + $0x2] sm:$0x1] %v35_v9  ;;  %53 = vst [vmem:[%s95_s1 + $0x3] sm:$0x1] %v41_v10 }

// kernel: graph_conv.1
= control target key start
LH: loop header
LB: loop body
LE: loop exit
PB: predicated region body
PF: predicated region fallthrough
CT: control target
= control target key end

     0   :  { %v280_v3 = vmov 0.0   ;;  %vm70_vm0 = vcmask 523264   ;;  %v50_v51 = vlaneseq  ;;  %s434_s1 = inlined_call_operand.vmem [shape: f32[64,512], index: 1, kind: input, shape index: {}]   ;;  %s435_s0 = inlined_call_operand.vmem [shape: f32[16,64], index: 0, kind: input, shape index: {}]   ;;  %s436_s2 = inlined_call_operand.vmem [shape: f32[1,512], index: 2, kind: input, shape index: {}]   ;;  %s437_s3 = inlined_call_operand.vmem [shape: f32[16,512], index: 3, kind: output, shape index: {}]  }
   0x1   :  { %v17_v0 = vld [vmem:[%s434_s1 + $0x8] sm:$0xff]  ;;  %v19_v2 = vld [vmem:[%s434_s1 + $0x18] sm:$0xff]  ;;  %141 = vmatprep.mubr.f32.mxu0 %v280_v3  ;;  %218 = vmatprep.mubr.f32.mxu1 %v280_v3  ;;  %v16_v6 = vld [vmem:[%s434_s1] sm:$0xff] }
   0x2   :  { %v21_v1 = vld [vmem:[%s434_s1 + $0x28] sm:$0xff]  ;;  %v23_v5 = vld [vmem:[%s434_s1 + $0x38] sm:$0xff]  ;;  %v20_v7 = vld [vmem:[%s434_s1 + $0x20] sm:$0xff]  ;;  %v51_v52 = vshrl.u32 %v50_v51, 7 }
   0x3   :  { %v247_v4 = vpack.c.bf16 %v21_v1, %v17_v0  ;;  %v263_v8 = vpack.c.bf16 %v23_v5, %v19_v2  ;;  %v249_v9 = vpack.c.bf16 %v20_v7, %v16_v6  ;;  %v18_v10 = vld [vmem:[%s434_s1 + $0x10] sm:$0xff]  ;;  %v25_v12 = vld [vmem:[%s434_s1 + $0x48] sm:$0xff]  ;;  %v27_v15 = vld [vmem:[%s434_s1 + $0x58] sm:$0xff] }
   0x4   :  { %v22_v11 = vld [vmem:[%s434_s1 + $0x30] sm:$0xff]  ;;  %v29_v14 = vld [vmem:[%s434_s1 + $0x68] sm:$0xff]  ;;  %v31_v16 = vld [vmem:[%s434_s1 + $0x78] sm:$0xff]  ;;  %v52_v53 = vsub.s32 0, %v51_v52  ;;  %v60_v55 = vsub.s32 2, %v51_v52  ;;  %v56_v56 = vsub.s32 1, %v51_v52 }
   0x5   :  { %248 = vmatprep.subr.bf16.mxu0 %v247_v4  ;;  %v265_v13 = vpack.c.bf16 %v22_v11, %v18_v10  ;;  %264 = vmatprep.subr.bf16.mxu1 %v263_v8  ;;  %v251_v17 = vpack.c.bf16 %v29_v14, %v25_v12  ;;  %v267_v18 = vpack.c.bf16 %v31_v16, %v27_v15  ;;  %v24_v19 = vld [vmem:[%s434_s1 + $0x40] sm:$0xff]  ;;  %v26_v21 = vld [vmem:[%s434_s1 + $0x50] sm:$0xff]  ;;  %v33_v24 = vld [vmem:[%s434_s1 + $0x88] sm:$0xff]  ;;  %v64_v57 = vsub.s32 3, %v51_v52 }
   0x6   :  { %250 = vmatpush1.bf16.msra.mxu0 %v249_v9  ;;  %v28_v20 = vld [vmem:[%s434_s1 + $0x60] sm:$0xff]  ;;  %v30_v23 = vld [vmem:[%s434_s1 + $0x70] sm:$0xff]  ;;  %v37_v25 = vld [vmem:[%s434_s1 + $0xa8] sm:$0xff] }
   0x7   :  { %266 = vmatpush1.bf16.msra.mxu1 %v265_v13  ;;  %v253_v22 = vpack.c.bf16 %v28_v20, %v24_v19  ;;  %252 = vmatprep.subr.bf16.mxu0 %v251_v17  ;;  %v269_v26 = vpack.c.bf16 %v30_v23, %v26_v21  ;;  %v255_v27 = vpack.c.bf16 %v37_v25, %v33_v24  ;;  %v35_v28 = vld [vmem:[%s434_s1 + $0x98] sm:$0xff]  ;;  %v32_v30 = vld [vmem:[%s434_s1 + $0x80] sm:$0xff]  ;;  %v34_v33 = vld [vmem:[%s434_s1 + $0x90] sm:$0xff] }
   0x8   :  { %268 = vmatprep.subr.bf16.mxu1 %v267_v18  ;;  %v39_v29 = vld [vmem:[%s434_s1 + $0xb8] sm:$0xff]  ;;  %v36_v32 = vld [vmem:[%s434_s1 + $0xa0] sm:$0xff]  ;;  %v38_v34 = vld [vmem:[%s434_s1 + $0xb0] sm:$0xff] }
   0x9   :  { %v271_v31 = vpack.c.bf16 %v39_v29, %v35_v28  ;;  %v257_v35 = vpack.c.bf16 %v36_v32, %v32_v30  ;;  %v41_v36 = vld [vmem:[%s434_s1 + $0xc8] sm:$0xff]  ;;  %v43_v38 = vld [vmem:[%s434_s1 + $0xd8] sm:$0xff]  ;;  %v273_v39 = vpack.c.bf16 %v38_v34, %v34_v33  ;;  %v40_v42 = vld [vmem:[%s434_s1 + $0xc0] sm:$0xff] }
   0xa   :  { %254 = vmatpush1.bf16.msra.mxu0 %v253_v22  ;;  %v45_v37 = vld [vmem:[%s434_s1 + $0xe8] sm:$0xff]  ;;  %v47_v41 = vld [vmem:[%s434_s1 + $0xf8] sm:$0xff]  ;;  %v44_v43 = vld [vmem:[%s434_s1 + $0xe0] sm:$0xff] }
   0xb   :  { %270 = vmatpush1.bf16.msra.mxu1 %v269_v26  ;;  %256 = vmatprep.subr.bf16.mxu0 %v255_v27  ;;  %v259_v40 = vpack.c.bf16 %v45_v37, %v41_v36  ;;  %v275_v44 = vpack.c.bf16 %v47_v41, %v43_v38  ;;  %v42_v45 = vld [vmem:[%s434_s1 + $0xd0] sm:$0xff]  ;;  %v261_v47 = vpack.c.bf16 %v44_v43, %v40_v42  ;;  %v14_v49 = vld [vmem:[%s435_s0] sm:$0xff]  ;;  %v15_v50 = vld [vmem:[%s435_s0 + $0x8] sm:$0xff] }
   0xc   :  { %272 = vmatprep.subr.bf16.mxu1 %v271_v31  ;;  %v46_v46 = vld [vmem:[%s434_s1 + $0xf0] sm:$0xff]  ;;  %v48_v54 = vld [vmem:[%s436_s2] sm:$0xf] }
   0xd   :  { %v277_v48 = vpack.c.bf16 %v46_v46, %v42_v45  ;;  %v53_v58 = vrot.slane %v48_v54, %v52_v53  ;;  %v61_v59 = vrot.slane %v48_v54, %v60_v55  ;;  %v57_v60 = vrot.slane %v48_v54, %v56_v56 }
   0xe   :  { %258 = vmatpush1.bf16.msra.mxu0 %v257_v35  ;;  %v65_v61 = vrot.slane %v48_v54, %v64_v57 }
   0xf   :  { %274 = vmatpush1.bf16.msra.mxu1 %v273_v39  ;;  %260 = vmatprep.subr.bf16.mxu0 %v259_v40 }
  0x10   :  { %276 = vmatprep.subr.bf16.mxu1 %v275_v44 }
  0x12   :  { %262 = vmatpush1.bf16.msra.mxu0 %v261_v47 }
  0x13   :  { %278 = vmatpush1.bf16.msra.mxu1 %v277_v48 }
  0x15   :  { %243 = vmatmul.mubr.msk.f32.vlgmr.msra.gmra.mrb[0].mxu0 %vm70_vm0, %v14_v49 }
  0x16   :  { %245 = vmatmul.mubr.msk.f32.vlgmr.msra.gmra.mrb[0].mxu1 %vm70_vm0, %v14_v49  ;;  %147 = vmatprep.mubr.f32.mxu0 %v280_v3 }
  0x17   :  { %224 = vmatprep.mubr.f32.mxu1 %v280_v3 }
  0x19   :  { %244 = vmatmul.mubr.msk.f32.gmra.mrb[2].mxu0 %vm70_vm0, %v15_v50 }
  0x1a   :  { %246 = vmatmul.mubr.msk.f32.gmra.mrb[2].mxu1 %vm70_vm0, %v15_v50 }
  0xe8   :  { %v143_v62 = vpop.f32.mrb[0].mxu0 }
  0xe9   :  { %v144_v63 = vadd.f32 %v143_v62, %v53_v58  ;;  %v220_v0 = vpop.f32.mrb[0].mxu1  ;;  %v145_v1 = vpop.f32.mrb[1].mxu0 }
  0xea   :  { %v221_v2 = vadd.f32 %v220_v0, %v61_v59  ;;  %v146_v3 = vadd.f32 %v145_v1, %v57_v60  ;;  %v222_v4 = vpop.f32.mrb[1].mxu1 }
  0xeb   :  { %231 = vst [vmem:[%s437_s3] sm:$0xff] %v144_v63  ;;  %v223_v5 = vadd.f32 %v222_v4, %v65_v61 }
  0xec   :  { %233 = vst [vmem:[%s437_s3 + $0x10] sm:$0xff] %v221_v2  ;;  %232 = vst [vmem:[%s437_s3 + $0x8] sm:$0xff] %v146_v3  ;;  %v149_v6 = vpop.f32.mrb[2].mxu0 }
  0xed   :  { %234 = vst [vmem:[%s437_s3 + $0x18] sm:$0xff] %v223_v5  ;;  %v150_v7 = vadd.f32 %v149_v6, %v53_v58  ;;  %v226_v8 = vpop.f32.mrb[2].mxu1  ;;  %v151_v9 = vpop.f32.mrb[3].mxu0 }
  0xee   :  { %v227_v10 = vadd.f32 %v226_v8, %v61_v59  ;;  %v152_v11 = vadd.f32 %v151_v9, %v57_v60  ;;  %v228_v12 = vpop.f32.mrb[3].mxu1 }
  0xef   :  { %235 = vst [vmem:[%s437_s3 + $0x20] sm:$0xff] %v150_v7  ;;  %v229_v13 = vadd.f32 %v228_v12, %v65_v61 }
  0xf0   :  { %237 = vst [vmem:[%s437_s3 + $0x30] sm:$0xff] %v227_v10  ;;  %236 = vst [vmem:[%s437_s3 + $0x28] sm:$0xff] %v152_v11 }
  0xf1   :  { %238 = vst [vmem:[%s437_s3 + $0x38] sm:$0xff] %v229_v13 }

</bundles_post_ra>
